<compile_context>
chip_gen: v7x
topology: tpu7x:2x2x1
jax: 0.10.0
libtpu: 0.0.40
codegen_flags: <defaults>
</compile_context>

<pallas_src>
import jax
import jax.numpy as jnp
from jax.experimental import pallas as pl
from jax.experimental.pallas import tpu as pltpu


_TOTAL_VMEM_BUDGET = 12 << 20     # bytes: whole double-buffered working set
_MIN_GRID_STEPS = 8               # >= 4 steps per TensorCore on dual-core v7x
_SPLIT_THRESHOLD_BYTES = 4 << 20  # only force extra grid steps above this size


def _largest_divisor_tile(dim: int, quantum: int, cap: int) -> int:
    """Largest divisor of `dim` that is a multiple of `quantum` and <= cap."""
    cap = max(quantum, min(dim, cap))
    cap -= cap % quantum
    t = cap
    while t > quantum:
        if dim % t == 0:
            return t
        t -= quantum
    return quantum


def _select_tiles(R: int, L: int, quantum: int, isz: int, row_params: bool):
    """Pick (tile_r, tile_l) so the full working set stays under the budget."""
    budget = _TOTAL_VMEM_BUDGET

    def total_bytes(tr: int, tl: int) -> int:
        data = 4 * tr * tl * isz                  # 2 input + 2 output buffers
        if row_params:                            # (tr, 2) f32 pads to 128 lanes
            par = 2 * tr * 128 * 4
        else:                                     # (2, tl) f32 pads to 8 sublanes
            par = 2 * 8 * tl * 4
        return data + par

    min_r = quantum if R % quantum == 0 else R

    # Lane (fast) dimension: prefer the full row -> one contiguous HBM range per
    # block.  Only split lanes when even a minimum-row block blows the budget.
    if L % 128 == 0 and total_bytes(min_r, L) > budget:
        if row_params:
            cap_l = (budget - 2 * min_r * 128 * 4) // (4 * min_r * isz)
        else:
            cap_l = budget // (4 * min_r * isz + 2 * 8 * 4)
        tile_l = _largest_divisor_tile(L, 128, max(128, cap_l))
    else:
        tile_l = L  # full width (also the only legal choice when L % 128 != 0)

    # Row (sublane) dimension: as many rows as the remaining budget allows.
    if R % quantum == 0:
        if row_params:
            cap_r = budget // (4 * tile_l * isz + 2 * 128 * 4)
        else:
            cap_r = (budget - 2 * 8 * tile_l * 4) // (4 * tile_l * isz)
        tile_r = _largest_divisor_tile(R, quantum, max(quantum, cap_r))
    else:
        tile_r = R

    # Guarantee enough grid steps for megacore sharding + per-core pipelining.
    # Shrinking the sublane dim is nearly free; keep the lane dim >= 512.
    if R * L * isz > _SPLIT_THRESHOLD_BYTES:
        def steps(tr, tl):
            return (R // tr) * (L // tl)
        while steps(tile_r, tile_l) < _MIN_GRID_STEPS and tile_r % (2 * quantum) == 0:
            tile_r //= 2
        while steps(tile_r, tile_l) < _MIN_GRID_STEPS and tile_l % 256 == 0 and tile_l >= 1024:
            tile_l //= 2

    return tile_r, tile_l, total_bytes(tile_r, tile_l)


def _row_affine_kernel(x_ref, p_ref, o_ref):
    # x/o: (tile_r, tile_l) tiles; p: (tile_r, 2) with [:, 0]=scale, [:, 1]=bias.
    p = p_ref[...]
    x = x_ref[...].astype(jnp.float32)
    o_ref[...] = (x * p[:, 0:1] + p[:, 1:2]).astype(o_ref.dtype)


def _lane_affine_kernel(x_ref, p_ref, o_ref):
    # x/o: (tile_r, tile_l) tiles; p: (2, tile_l) with [0]=scale, [1]=bias.
    p = p_ref[...]
    x = x_ref[...].astype(jnp.float32)
    o_ref[...] = (x * p[0:1, :] + p[1:2, :]).astype(o_ref.dtype)


def normalize_layer(x: jax.Array, means: jax.Array, sds: jax.Array) -> jax.Array:
    """(x - means[c]) / sds[c], broadcasting over batch and spatial dims.

    x: (B, C, H, W); means, sds: (C,).
    """
    B, C, H, W = x.shape
    HW = H * W
    isz = jnp.dtype(x.dtype).itemsize
    quantum = max(8, 32 // isz)  # sublane quantum: 8 f32, 16 bf16, 32 int8/fp8

    # Per-channel affine parameters, computed once in f32 outside the kernel.
    inv_sds = (1.0 / sds.astype(jnp.float32))
    neg_mean = (-means.astype(jnp.float32)) * inv_sds

    row_params = (HW % 128 == 0)
    if row_params:
        # Lane-friendly spatial size: (B*C, H*W), per-row merged [scale, bias].
        R, L = B * C, HW
        x2 = x.reshape(R, L)
        params = jnp.stack([jnp.tile(inv_sds, B), jnp.tile(neg_mean, B)], axis=1)  # (R, 2)
        kernel = _row_affine_kernel
    else:
        # Lane-unfriendly H*W (e.g. 7x7, 14x14): (B, C*H*W) keeps stores
        # lane-dense; params become tiny per-lane vectors of length C*H*W.
        R, L = B, C * HW
        x2 = x.reshape(R, L)
        params = jnp.stack([jnp.repeat(inv_sds, HW), jnp.repeat(neg_mean, HW)], axis=0)  # (2, L)
        kernel = _lane_affine_kernel

    tile_r, tile_l, est_bytes = _select_tiles(R, L, quantum, isz, row_params)
    grid = (R // tile_r, L // tile_l)

    if row_params:
        p_spec = pl.BlockSpec((tile_r, 2), lambda r, c: (r, 0))
    else:
        p_spec = pl.BlockSpec((2, tile_l), lambda r, c: (0, c))

    cp_kwargs = dict(dimension_semantics=("parallel", "parallel"))
    if est_bytes > _TOTAL_VMEM_BUDGET:
        # Rare path (R not a multiple of the sublane quantum *and* very large):
        # raise the scoped-VMEM limit but stay well under v7x's 64 MiB physical.
        cp_kwargs["vmem_limit_bytes"] = int(min(est_bytes + (4 << 20), 48 << 20))

    out2 = pl.pallas_call(
        kernel,
        out_shape=jax.ShapeDtypeStruct((R, L), x.dtype),
        grid=grid,
        in_specs=[
            pl.BlockSpec((tile_r, tile_l), lambda r, c: (r, c)),  # x tile
            p_spec,                                               # merged scale/bias
        ],
        out_specs=pl.BlockSpec((tile_r, tile_l), lambda r, c: (r, c)),
        compiler_params=pltpu.CompilerParams(**cp_kwargs),
    )(x2, params)

    return out2.reshape(B, C, H, W)


if __name__ == "__main__":
    # Deterministic "dataset statistics" (CIFAR-10 channel means / stds).
    means = jnp.asarray([0.4914, 0.4822, 0.4465], dtype=jnp.float32)
    sds = jnp.asarray([0.2023, 0.1994, 0.2010], dtype=jnp.float32)

    key = jax.random.PRNGKey(0)

    # Small NCHW input: batch=2, channels=3, 16x16 spatial (lane-friendly path).
    x = jax.random.uniform(key, (2, 3, 16, 16), dtype=jnp.float32)
    out = jax.block_until_ready(normalize_layer(x, means, sds))
    ref = (x - means[None, :, None, None]) / sds[None, :, None, None]
    assert out.shape == x.shape and out.dtype == x.dtype
    assert jnp.allclose(out, ref, atol=1e-5, rtol=1e-5)

    # Also exercise the lane-unfriendly (14x14) layout path.
    x2 = jax.random.uniform(jax.random.PRNGKey(1), (2, 3, 14, 14), dtype=jnp.float32)
    out2 = jax.block_until_ready(normalize_layer(x2, means, sds))
    ref2 = (x2 - means[None, :, None, None]) / sds[None, :, None, None]
    assert jnp.allclose(out2, ref2, atol=1e-5, rtol=1e-5)

    print("KERNEL_OK")
</pallas_src>

<mosaic_0001>
module attributes {stable_mosaic.version = 11 : i64} {
  func.func @_row_affine_kernel(%arg0: i32, %arg1: i32, %arg2: memref<6x256xf32, #tpu.memory_space<vmem>>, %arg3: memref<6x2xf32, #tpu.memory_space<vmem>>, %arg4: memref<6x256xf32, #tpu.memory_space<vmem>>) attributes {dimension_semantics = [#tpu.dimension_semantics<parallel>, #tpu.dimension_semantics<parallel>], iteration_bounds = array<i64: 1, 1>, scalar_prefetch = 0 : i64, scratch_operands = 0 : i64, tpu.core_type = #tpu.core_type<tc>, window_params = [{transform_indices = @transform_0, window_bounds = array<i64: 6, 256>}, {transform_indices = @transform_1, window_bounds = array<i64: 6, 2>}, {transform_indices = @transform_2, window_bounds = array<i64: 6, 256>}]} {
    %c0 = arith.constant 0 : index
    %c0_0 = arith.constant 0 : index
    %0 = vector.load %arg3[%c0, %c0_0] : memref<6x2xf32, #tpu.memory_space<vmem>>, vector<6x2xf32>
    %c0_1 = arith.constant 0 : index
    %c0_2 = arith.constant 0 : index
    %1 = vector.load %arg2[%c0_1, %c0_2] : memref<6x256xf32, #tpu.memory_space<vmem>>, vector<6x256xf32>
    %2 = vector.extract_strided_slice %0 {offsets = [0, 0], sizes = [6, 1], strides = [1, 1]} : vector<6x2xf32> to vector<6x1xf32>
    %3 = vector.broadcast %2 : vector<6x1xf32> to vector<6x256xf32>
    %4 = arith.mulf %1, %3 : vector<6x256xf32>
    %5 = vector.extract_strided_slice %0 {offsets = [0, 1], sizes = [6, 1], strides = [1, 1]} : vector<6x2xf32> to vector<6x1xf32>
    %6 = vector.broadcast %5 : vector<6x1xf32> to vector<6x256xf32>
    %7 = arith.addf %4, %6 : vector<6x256xf32>
    %c0_3 = arith.constant 0 : index
    %c0_4 = arith.constant 0 : index
    %8 = vector.load %arg4[%c0_3, %c0_4] : memref<6x256xf32, #tpu.memory_space<vmem>>, vector<6x256xf32>
    tpu.vector_store %arg4[%c0_3, %c0_4], %7 {strides = array<i32>} : memref<6x256xf32, #tpu.memory_space<vmem>>, vector<6x256xf32>,
    return
  }
  func.func @transform_0(%arg0: i32, %arg1: i32) -> (i32, i32) {
    %c0_i32 = arith.constant 0 : i32
    return %arg0, %arg1 : i32, i32
  }
  func.func @transform_1(%arg0: i32, %arg1: i32) -> (i32, i32) {
    %c0_i32 = arith.constant 0 : i32
    %c0_i32_0 = arith.constant 0 : i32
    return %arg0, %c0_i32 : i32, i32
  }
  func.func @transform_2(%arg0: i32, %arg1: i32) -> (i32, i32) {
    %c0_i32 = arith.constant 0 : i32
    return %arg0, %arg1 : i32, i32
  }
}

</mosaic_0001>

<bundles_post_ra>
// kernel: tpu_custom_call.1
= control target key start
LH: loop header
LB: loop body
LE: loop exit
PB: predicated region body
PF: predicated region fallthrough
CT: control target
= control target key end

     0   :  { %7 = vsyncpa [#allocation3], 0  ;;  %s157_s0 = inlined_call_operand.hbm [shape: f32[6,256], index: 0, kind: input, shape index: {}]   ;;  %s158_s1 = inlined_call_operand.vmem [shape: f32[6,2], index: 1, kind: input, shape index: {}]   ;;  %s159_s2 = inlined_call_operand.hbm [shape: f32[6,256], index: 2, kind: output, shape index: {}]  }
   0x1   :  { %8 = vsyncpa [#allocation4], 0  ;;  %s111_s9 = smov [#allocation2]   ;;  %s63_s13 = scalar_lea.hbm %s157_s0, 256 }
   0x2   :  { %s15_s10 = sshll.u32 %s111_s9, 4  ;;  %p64_p0 = scmp.ne.s32.totalorder %s157_s0, %s63_s13  ;;  %s16_s10 = int_to_ptr.vmem [resolvable:$true] %s15_s10 }
   0x3   :  { %p67_p1 = scmp.lt.u32.totalorder %s63_s13, %s157_s0 }
   0x5   :  { %p69_p2 = pnand %p67_p1, %p64_p0 }
   0x7   :  { %72 = shalt.err (!%p69_p2)
}
   0x8   :  { %s73_s18 = scalar_lea.vmem %s16_s10, 256  ;;  %p78_p4 = scmp.lt.s32.totalorder %s16_s10, %s16_s10 }
   0x9   :  { %p74_p3 = scmp.ne.s32.totalorder %s16_s10, %s73_s18  ;;  %p79_p5 = scmp.lt.s32.totalorder %s73_s18, %s73_s18 }
   0xb   :  { %p80_p6 = por %p79_p5, %p78_p4 }
   0xd   :  { %p81_p7 = pnand %p80_p6, %p74_p3 }
   0xf   :  { %84 = shalt.err (!%p81_p7)
}
  0x10   :  { %18 = dma.hbm_to_vmem [thread:$0]  %s157_s0, 256, %s16_s10, [#allocation3]  }
  0x11   :  { %107 = dma.done.wait [#allocation3], 256  }
  0x12   :  { %108 = vsyncadd [#allocation3], 4294967040  ;;  %v112_v0 = vmov 0   ;;  %v24_v1 = vld [vmem:[%s158_s1] sm:$0x3f]  ;;  %v113_v2 = vmov 1  }
  0x13   :  { %61 = vset.pattern.permute.xlu0 %v112_v0  ;;  %v25_v4 = vld [vmem:[#allocation2] sm:$0x3f]  ;;  %v26_v5 = vld [vmem:[#allocation2 + $0x8] sm:$0x3f]  ;;  %s114_s23 = smov [#allocation5]  }
  0x14   :  { %29 = vperm.xlu0 %61, %v24_v1   ;;  %s48_s24 = sshll.u32 %s114_s23, 4  ;;  %s49_s24 = int_to_ptr.vmem [resolvable:$true] %s48_s24 }
  0x15   :  { %s85_s0 = scalar_lea.vmem %s49_s24, 256  ;;  %p90_p9 = scmp.lt.s32.totalorder %s49_s24, %s49_s24 }
  0x16   :  { %p86_p8 = scmp.ne.s32.totalorder %s49_s24, %s85_s0  ;;  %p91_p10 = scmp.lt.s32.totalorder %s85_s0, %s85_s0 }
  0x18   :  { %62 = vset.pattern.permute.xlu0 %v113_v2  ;;  %p92_p11 = por %p91_p10, %p90_p9 }
  0x19   :  { %35 = vperm.xlu0 %62, %v24_v1  }
  0x1a   :  { %p93_p12 = pnand %p92_p11, %p86_p8 }
  0x93   :  { %v30_v3 = vpop.permute.xlu0 %29 }
  0x94   :  { %v32_v6 = vmul.f32 %v30_v3, %v25_v4  ;;  %v33_v7 = vmul.f32 %v30_v3, %v26_v5 }
  0x98   :  { %v36_v8 = vpop.permute.xlu0 %35 }
  0x99   :  { %v38_v9 = vadd.f32 %v36_v8, %v32_v6  ;;  %v39_v10 = vadd.f32 %v36_v8, %v33_v7 }
  0x9b   :  { %40 = vst [vmem:[#allocation5] sm:$0x3f] %v38_v9  ;;  %41 = vst [vmem:[#allocation5 + $0x8] sm:$0x3f] %v39_v10 }
  0x9c   :  { %96 = shalt.err (!%p93_p12)
}
  0x9d   :  { %s97_s26 = scalar_lea.hbm %s159_s2, 256 }
  0x9e   :  { %p98_p13 = scmp.ne.s32.totalorder %s159_s2, %s97_s26  ;;  %p101_p0 = scmp.lt.u32.totalorder %s97_s26, %s159_s2 }
  0xa0   :  { %p103_p1 = pnand %p101_p0, %p98_p13 }
  0xa2   :  { %106 = shalt.err (!%p103_p1)
}
  0xa3   :  { %51 = dma.vmem_to_hbm [thread:$0]  %s49_s24, 256, %s159_s2, [#allocation4]  }
  0xa4   :  { %109 = dma.done.wait [#allocation4], 256  }
  0xa5   :  { %110 = vsyncadd [#allocation4], 4294967040 }
  0xa6   :  { %55 = vsyncpa [#allocation3], 1 }
  0xa7   :  { %56 = vsyncpa [#allocation4], 1 }

</bundles_post_ra>
